<compile_context>
chip_gen: v6e
topology: v6e:2x2x1
jax: 0.10.0
libtpu: 0.0.40
codegen_flags: <defaults>
</compile_context>

<pallas_src>
import functools
import math

import jax
import jax.numpy as jnp
from jax import lax
from jax.experimental import pallas as pl
from jax.experimental.pallas import tpu as pltpu


def _round_up(x: int, m: int) -> int:
    return (x + m - 1) // m * m


def _cdiv(a: int, b: int) -> int:
    return (a + b - 1) // b


# ---------------------------------------------------------------------------
# Fast path: whole table resident in VMEM; gather as a one-hot MXU matmul.
# ---------------------------------------------------------------------------
def _onehot_matmul_kernel(ids_ref, table_ref, out_ref, acc_ref, *,
                          scale, v_chunk, num_v_chunks, precision):
    # ids_ref:   (tok_tile, 1) int32 VMEM block of token ids for this tile
    # table_ref: (V_pad, D) full table, VMEM resident (constant index map)
    # out_ref:   (tok_tile, D) output tile
    # acc_ref:   (tok_tile, D) f32 accumulator scratch
    ids = ids_ref[...]                                   # (tok_tile, 1) int32
    tok_tile = out_ref.shape[0]

    acc_ref[...] = jnp.zeros_like(acc_ref)

    def body(c, carry):
        v0 = pl.multiple_of(c * v_chunk, 8)
        tab = table_ref[pl.ds(v0, v_chunk), :]           # (v_chunk, D)
        col = lax.broadcasted_iota(jnp.int32, (tok_tile, v_chunk), 1) + v0
        onehot = (ids == col).astype(tab.dtype)          # (tok_tile, v_chunk)
        acc_ref[...] += jnp.dot(onehot, tab,
                                preferred_element_type=jnp.float32,
                                precision=precision)
        return carry

    lax.fori_loop(0, num_v_chunks, body, 0)

    # Single f32 scale pass + one dense (sublane/lane) store of the whole tile.
    out_ref[...] = (acc_ref[...] * scale).astype(out_ref.dtype)


# ---------------------------------------------------------------------------
# General path: table stays in HBM; DMA-ring gather straight into the out tile.
# ---------------------------------------------------------------------------
def _hbm_gather_kernel(ids_ref, table_ref, out_ref, sem_ref, *,
                       scale, tok_tile, depth, n_ids):
    # ids_ref:   scalar-prefetched flat token ids in SMEM (n_ids,)
    # table_ref: (V, D) table ref in HBM (memory_space=pl.ANY)
    # out_ref:   (tok_tile, D) output tile in VMEM — the DMA gather destination
    # sem_ref:   (depth,) DMA semaphore ring
    base = pl.program_id(0) * tok_tile

    def row_copy(row, t, slot):
        return pltpu.make_async_copy(
            table_ref.at[pl.ds(row, 1), :],
            out_ref.at[pl.ds(t, 1), :],
            sem_ref.at[slot],
        )

    # Prime the ring: `depth` outstanding row-gather DMAs into the output tile.
    for t in range(depth):
        row_copy(ids_ref[base + t], t, t).start()

    def body(t, carry):
        slot = t % depth
        row_t = ids_ref[base + t]
        # Hoist the next id read ahead of the wait: a DMA .wait() breaks SMEM
        # sst->sld forwarding, so keep scalar loads off the post-wait path.
        nxt_idx = jnp.minimum(base + t + depth, n_ids - 1)
        row_next = ids_ref[nxt_idx]

        row_copy(row_t, t, slot).wait()

        @pl.when(t + depth < tok_tile)
        def _():
            row_copy(row_next, t + depth, slot).start()

        return carry

    lax.fori_loop(0, tok_tile, body, 0)

    # One vectorized f32 scale pass, in place over the gathered dense tile.
    out_ref[...] = (out_ref[...].astype(jnp.float32) * scale).astype(out_ref.dtype)


# ---------------------------------------------------------------------------
# Wrapper
# ---------------------------------------------------------------------------
def embeddings_forward(
    ids: jax.Array,
    table: jax.Array,
    *,
    tok_tile: int | None = None,
    force_hbm_path: bool = False,
    vmem_table_limit_bytes: int = 4 * 1024 * 1024,
    dot_precision=None,
) -> jax.Array:
    """ids: (...,) int token indices; table: (V, D). Returns table[ids]*sqrt(D)."""
    lead_shape = ids.shape
    V, D = table.shape
    scale = float(math.sqrt(D))
    itemsize = table.dtype.itemsize

    # Clamp ids so an out-of-range token can never trigger an OOB row fetch.
    flat_ids = jnp.clip(ids.reshape(-1).astype(jnp.int32), 0, V - 1)
    n_tok = int(flat_ids.shape[0])

    table_bytes = V * D * itemsize
    use_vmem_table = (table_bytes <= vmem_table_limit_bytes) and not force_hbm_path

    # Planning budget (works with the explicit 32 MiB scoped-VMEM limit below,
    # which is within physical VMEM on v5e/v6e (128 MiB) and v7x (64 MiB)).
    vmem_budget = 24 * 1024 * 1024
    row_bytes = D * itemsize

    if use_vmem_table:
        # Vocab chunking keeps the (tok_tile, v_chunk) one-hot tile bounded.
        v_pad8 = _round_up(V, 8)
        num_v_chunks = _cdiv(v_pad8, 512)
        v_chunk = _round_up(_cdiv(v_pad8, num_v_chunks), 8)
        V_pad = v_chunk * num_v_chunks
        table_pad_bytes = V_pad * row_bytes
        # 2x out tile (double-buffered) + f32 acc + one-hot chunk + ids block,
        # after reserving 2x the (double-buffered, constant-index) table block.
        per_row = 2 * row_bytes + 4 * D + v_chunk * itemsize + 8
        avail = max(vmem_budget - 2 * table_pad_bytes, 64 * per_row)
    else:
        # 2x out tile (double-buffered) + transient f32 scale pass.
        per_row = 2 * row_bytes + 4 * D + 8
        avail = vmem_budget

    max_rows = max(8, (avail // per_row) // 8 * 8)

    if tok_tile is None:
        tok_tile = min(1024, max_rows)
        # Keep >= 2 grid steps when there are enough tokens (v7x has 2 TCs).
        tok_tile = min(tok_tile, _round_up(max(8, _cdiv(n_tok, 2)), 8))
    tok_tile = min(int(tok_tile), max_rows, _round_up(n_tok, 8))
    tok_tile = max(8, _round_up(tok_tile, 8))

    # Pad the token stream to a multiple of TOK_TILE (pad id 0 -> valid row).
    n_pad = _round_up(n_tok, tok_tile)
    if n_pad != n_tok:
        flat_ids = jnp.pad(flat_ids, (0, n_pad - n_tok))
    grid = (n_pad // tok_tile,)

    compiler_params = pltpu.CompilerParams(
        dimension_semantics=("parallel",),
        vmem_limit_bytes=32 * 1024 * 1024,
    )
    out_shape = jax.ShapeDtypeStruct((n_pad, D), table.dtype)

    if use_vmem_table:
        table_in = table
        if V_pad != V:
            # Padded rows never match a (clamped) id -> contribute zeros.
            table_in = jnp.pad(table, ((0, V_pad - V), (0, 0)))
        ids_in = flat_ids.reshape(n_pad, 1)
        kernel = functools.partial(
            _onehot_matmul_kernel, scale=scale, v_chunk=v_chunk,
            num_v_chunks=num_v_chunks, precision=dot_precision)
        grid_spec = pltpu.PrefetchScalarGridSpec(
            num_scalar_prefetch=0,
            grid=grid,
            in_specs=[
                # Per-tile token-id block (VMEM).
                pl.BlockSpec((tok_tile, 1), lambda i: (i, 0)),
                # Whole table as one VMEM-resident block (constant index map).
                pl.BlockSpec((V_pad, D), lambda i: (0, 0)),
            ],
            out_specs=pl.BlockSpec((tok_tile, D), lambda i: (i, 0)),
            scratch_shapes=[pltpu.VMEM((tok_tile, D), jnp.float32)],
        )
        out_flat = pl.pallas_call(
            kernel, out_shape=out_shape, grid_spec=grid_spec,
            compiler_params=compiler_params,
        )(ids_in, table_in)
    else:
        depth = min(8, tok_tile)
        # TODO(synk): ids are scalar-prefetched whole (row addresses must live
        # in SMEM); for multi-100K-token streams switch to per-tile SMEM blocks.
        kernel = functools.partial(
            _hbm_gather_kernel, scale=scale, tok_tile=tok_tile,
            depth=depth, n_ids=n_pad)
        grid_spec = pltpu.PrefetchScalarGridSpec(
            num_scalar_prefetch=1,
            grid=grid,
            in_specs=[
                # Table stays in HBM; rows are gathered with manual DMAs.
                pl.BlockSpec(memory_space=pl.ANY),
            ],
            out_specs=pl.BlockSpec((tok_tile, D), lambda i, ids_ref: (i, 0)),
            scratch_shapes=[pltpu.SemaphoreType.DMA((depth,))],
        )
        out_flat = pl.pallas_call(
            kernel, out_shape=out_shape, grid_spec=grid_spec,
            compiler_params=compiler_params,
        )(flat_ids, table)

    return out_flat[:n_tok].reshape(*lead_shape, D)


if __name__ == "__main__":
    # Small shapes: vocab=64, model_dimension=32, batch=2, seq=8.
    VOCAB = 64
    D_MODEL = 32
    B, S = 2, 8

    key = jax.random.PRNGKey(0)
    k_tab, k_ids = jax.random.split(key)

    # nn.Embedding default init: N(0, 1).  Values are snapped to bf16-
    # representable f32 so the MXU one-hot gather in the fast path is bit-exact
    # regardless of matmul pass count, keeping the checks below tight.
    table = jax.random.normal(k_tab, (VOCAB, D_MODEL), dtype=jnp.float32)
    table = table.astype(jnp.bfloat16).astype(jnp.float32)
    ids = jax.random.randint(k_ids, (B, S), 0, VOCAB, dtype=jnp.int32)

    ref = table[ids] * math.sqrt(D_MODEL)

    # Fast path: whole table resident in VMEM, one-hot MXU gather.
    out_fast = jax.block_until_ready(embeddings_forward(ids, table))
    assert out_fast.shape == (B, S, D_MODEL)
    assert jnp.allclose(out_fast, ref, atol=1e-5, rtol=1e-5), (
        float(jnp.max(jnp.abs(out_fast - ref))))

    # General path: table kept in HBM, DMA-ring gather straight into the output
    # tile (forced here so both code paths are exercised at small shapes).
    out_hbm = jax.block_until_ready(
        embeddings_forward(ids, table, force_hbm_path=True))
    assert out_hbm.shape == (B, S, D_MODEL)
    assert jnp.allclose(out_hbm, ref, atol=1e-6, rtol=1e-6), (
        float(jnp.max(jnp.abs(out_hbm - ref))))

    print("KERNEL_OK")
</pallas_src>

<mosaic_0001>
module attributes {stable_mosaic.version = 11 : i64} {
  func.func @_onehot_matmul_kernel(%arg0: i32, %arg1: memref<8x1xi32, #tpu.memory_space<vmem>>, %arg2: memref<64x32xf32, #tpu.memory_space<vmem>>, %arg3: memref<8x32xf32, #tpu.memory_space<vmem>>, %arg4: memref<8x32xf32, #tpu.memory_space<vmem>>) attributes {dimension_semantics = [#tpu.dimension_semantics<parallel>], iteration_bounds = array<i64: 2>, scalar_prefetch = 0 : i64, scratch_operands = 1 : i64, tpu.core_type = #tpu.core_type<tc>, window_params = [{transform_indices = @transform_0, window_bounds = array<i64: 8, 1>}, {pipeline_mode = #tpu.pipeline_mode<synchronous>, transform_indices = @transform_1, window_bounds = array<i64: 64, 32>}, {transform_indices = @transform_2, window_bounds = array<i64: 8, 32>}]} {
    %c0 = arith.constant 0 : index
    %c0_0 = arith.constant 0 : index
    %0 = vector.load %arg1[%c0, %c0_0] : memref<8x1xi32, #tpu.memory_space<vmem>>, vector<8x1xi32>
    %cst = arith.constant 0.000000e+00 : f32
    %1 = vector.broadcast %cst : f32 to vector<8x32xf32>
    %c0_1 = arith.constant 0 : index
    %c0_2 = arith.constant 0 : index
    %2 = vector.load %arg4[%c0_1, %c0_2] : memref<8x32xf32, #tpu.memory_space<vmem>>, vector<8x32xf32>
    tpu.vector_store %arg4[%c0_1, %c0_2], %1 {strides = array<i32>} : memref<8x32xf32, #tpu.memory_space<vmem>>, vector<8x32xf32>,
    %c0_i32 = arith.constant 0 : i32
    %c64_i32 = arith.constant 64 : i32
    %3 = arith.muli %c0_i32, %c64_i32 : i32
    %4 = tpu.assume_multiple %3, 8 : i32
    %5 = arith.index_cast %4 : i32 to index
    %c0_3 = arith.constant 0 : index
    %6 = vector.load %arg2[%5, %c0_3] : memref<64x32xf32, #tpu.memory_space<vmem>>, vector<64x32xf32>
    %7 = tpu.iota {dimensions = array<i32: 1>} : vector<8x64xi32>
    %8 = vector.broadcast %4 : i32 to vector<8x64xi32>
    %9 = arith.addi %7, %8 : vector<8x64xi32>
    %10 = vector.broadcast %0 : vector<8x1xi32> to vector<8x64xi32>
    %11 = arith.cmpi eq, %10, %9 : vector<8x64xi32>
    %12 = arith.extui %11 : vector<8x64xi1> to vector<8x64xi32>
    %13 = arith.sitofp %12 : vector<8x64xi32> to vector<8x64xf32>
    %c0_4 = arith.constant 0 : index
    %c0_5 = arith.constant 0 : index
    %14 = vector.load %arg4[%c0_4, %c0_5] : memref<8x32xf32, #tpu.memory_space<vmem>>, vector<8x32xf32>
    %cst_6 = arith.constant dense<0.000000e+00> : vector<8x32xf32>
    %15 = tpu.matmul %13, %6, %cst_6 {dimension_numbers = #tpu.dot_dimension_numbers<[1], [0], [0], [1], [0, 0, 1, 1], [], []>} : vector<8x64xf32>, vector<64x32xf32>, vector<8x32xf32> -> vector<8x32xf32>
    %16 = arith.addf %14, %15 : vector<8x32xf32>
    %c0_7 = arith.constant 0 : index
    %c0_8 = arith.constant 0 : index
    %17 = vector.load %arg4[%c0_7, %c0_8] : memref<8x32xf32, #tpu.memory_space<vmem>>, vector<8x32xf32>
    tpu.vector_store %arg4[%c0_7, %c0_8], %16 {strides = array<i32>} : memref<8x32xf32, #tpu.memory_space<vmem>>, vector<8x32xf32>,
    %c1_i32 = arith.constant 1 : i32
    %c0_9 = arith.constant 0 : index
    %c0_10 = arith.constant 0 : index
    %18 = vector.load %arg4[%c0_9, %c0_10] : memref<8x32xf32, #tpu.memory_space<vmem>>, vector<8x32xf32>
    %cst_11 = arith.constant 5.65685415 : f32
    %19 = vector.broadcast %cst_11 : f32 to vector<8x32xf32>
    %20 = arith.mulf %18, %19 : vector<8x32xf32>
    %c0_12 = arith.constant 0 : index
    %c0_13 = arith.constant 0 : index
    %21 = vector.load %arg3[%c0_12, %c0_13] : memref<8x32xf32, #tpu.memory_space<vmem>>, vector<8x32xf32>
    tpu.vector_store %arg3[%c0_12, %c0_13], %20 {strides = array<i32>} : memref<8x32xf32, #tpu.memory_space<vmem>>, vector<8x32xf32>,
    return
  }
  func.func @transform_0(%arg0: i32) -> (i32, i32) {
    %c0_i32 = arith.constant 0 : i32
    %c0_i32_0 = arith.constant 0 : i32
    return %arg0, %c0_i32 : i32, i32
  }
  func.func @transform_1(%arg0: i32) -> (i32, i32) {
    %c0_i32 = arith.constant 0 : i32
    %c0_i32_0 = arith.constant 0 : i32
    %c0_i32_1 = arith.constant 0 : i32
    return %c0_i32, %c0_i32_0 : i32, i32
  }
  func.func @transform_2(%arg0: i32) -> (i32, i32) {
    %c0_i32 = arith.constant 0 : i32
    %c0_i32_0 = arith.constant 0 : i32
    return %arg0, %c0_i32 : i32, i32
  }
}

</mosaic_0001>

<bundles_post_ra>
// kernel: tpu_custom_call.1
= control target key start
LH: loop header
LB: loop body
LE: loop exit
PB: predicated region body
PF: predicated region fallthrough
CT: control target
= control target key end

     0   :  { %7 = vsyncpa [#allocation4], 0  ;;  %s591_s0 = inlined_call_operand.vmem [shape: s32[16,1], index: 0, kind: input, shape index: {}]   ;;  %s592_s1 = inlined_call_operand.vmem [shape: f32[64,32], index: 1, kind: input, shape index: {}]   ;;  %s593_s2 = inlined_call_operand.hbm [shape: f32[16,32], index: 2, kind: output, shape index: {}]  }
   0x1   :  { %9 = vsyncpa [#allocation4 + $0x1], 0  ;;  %s477_s9 = smov 0   ;;  %s479_s10 = smov 0  }
   0x2   :  { %s481_s11 = smov 0   ;;  %s483_s12 = smov 0  }
   0x3 LB: > { %s498_s13 = sadd.s32 4294967295, %s456_s12   ;;  %s313_s14 = sadd.s32 4294967294, %s456_s12   ;;  %s456_s12 = sphi %s483_s12, %s599_s12   ;;  %s452_s11 = sphi %s481_s11, %s598_s11   ;;  %s448_s10 = sphi %s479_s10, %s597_s10   ;;  %s444_s9 = sphi %s477_s9, %s596_s9  }
   0x4   : > { %s502_s15 = sadd.s32 1, %s456_s12   ;;  %s69_s16 = sadd.s32 1, %s452_s11 }
   0x5   : > { %s66_s17 = ssub.s32 %s456_s12, %s502_s15  ;;  %p79_p0 = scmp.ne.s32.totalorder %s452_s11, %s448_s10 }
   0x6   : > { %p67_p1 = scmp.eq.s32.totalorder %s66_s17, 0  ;;  %p80_p2 = scmp.eq.s32.totalorder %s498_s13, 1 }
   0x7   : > { %p85_p3 = scmp.ne.s32.totalorder %s448_s10, %s444_s9  ;;  %p86_p4 = scmp.eq.s32.totalorder %s313_s14, 1 }
   0x8   : > { %s513_s18 = scalar_select %p67_p1, %s452_s11, %s69_s16  }
   0x9   : > { %p515_p5 = por %p80_p2, %p79_p0  ;;  %p519_p6 = por %p86_p4, %p85_p3 }
   0xa   : > { %p316_p7 = scmp.ge.s32.totalorder %s456_s12, 1  ;;  %p114_p8 = scmp.lt.s32.totalorder %s456_s12, 3 }
   0xc   : > { %p115_p9 = pnand %p316_p7, %p114_p8 }
   0xd   : > { %p135_p10 = scmp.lt.s32.totalorder (!%p115_p9), %s498_s13, 1  ;;  %s132_s23 = sand.u32 (!%p115_p9), 1, %s448_s10  }
   0xe   : > { %118 = sbr.rel (%p115_p9) target bundleno = 368 (0x170), region = 28  ;;  %s317_s24 = sshll.u32 (!%p115_p9), %s132_s23, 3 }
   0xf   : > { %s134_s26 = scalar_lea.vmem (!%p115_p9), [#allocation3], %s317_s24  ;;  %s461_s5 = smov (!%p115_p9), [#allocation3]  }
  0x10   : > { %s254_s27 = sshll.u32 (!%p115_p9), %s134_s26, 4  ;;  %s400_s6 = sshll.u32 (!%p115_p9), %s461_s5, 4  ;;  %s255_s27 = int_to_ptr.vmem [resolvable:$true] %s254_s27  ;;  %s401_s6 = int_to_ptr.vmem [resolvable:$false] %s400_s6 }
  0x11   : > { %s396_s4 = scalar_lea.vmem (!%p115_p9), %s255_s27, 128  ;;  %p403_p0 = scmp.lt.s32.totalorder (!%p115_p9), %s255_s27, %s401_s6 }
  0x12   : > { %p397_p11 = scmp.ne.s32.totalorder (!%p115_p9), %s255_s27, %s396_s4 }
  0x13   : > { %v149_v0 = vld [vmem:[%s592_s1 + $0x38] sm:$0xff]  ;;  %v458_v1 = vmov 0   ;;  %v459_v2 = vmov 0.0   ;;  %v148_v3 = vld [vmem:[%s592_s1 + $0x30] sm:$0xff]  ;;  %s136_s25 = scalar_select %p135_p10, %s498_s13, 1  ;;  %v147_v4 = vld [vmem:[%s592_s1 + $0x28] sm:$0xff]  ;;  %v150_v11 = vlaneseq }
  0x14   : > { %395 = vset.pattern.permute.xlu0 %v458_v1  ;;  %334 = vmatprep.subr.mxu0 %v459_v2  ;;  %vm460_vm0 = vmmov 0   ;;  %v146_v5 = vld [vmem:[%s592_s1 + $0x20] sm:$0xff]  ;;  %vm140_vm1 = vcmask 261120   ;;  %v145_v7 = vld [vmem:[%s592_s1 + $0x18] sm:$0xff]  ;;  %v144_v8 = vld [vmem:[%s592_s1 + $0x10] sm:$0xff]  ;;  %vm161_vm2 = vcmask 523264   ;;  %p398_p12 = pnand %p397_p11, %p515_p5 }
  0x15   : > { %335 = vmatpush3.msra.mxu0 %v149_v0  ;;  %s318_s28 = sshll.u32 %s136_s25, 3  ;;  %350 = vmatprep.mubr.msk.f32.mxu0 %vm460_vm0, %v459_v2  ;;  %141 = vst.msk [vmem:[#allocation2] sm:$0xff] %vm140_vm1, %v459_v2  ;;  %v143_v9 = vld [vmem:[%s592_s1 + $0x8] sm:$0xff]  ;;  %v142_v10 = vld [vmem:[%s592_s1] sm:$0xff]  ;;  %v151_v12 = vand.u32 127, %v150_v11  ;;  %s322_s25 = sshll.u32 %s498_s13, 7 }
  0x16   : > { %336 = vmatprep.subr.mxu0 %v459_v2  ;;  %s138_s3 = scalar_lea.vmem %s591_s0, %s318_s28  ;;  %s252_s30 = scalar_lea.hbm %s593_s2, %s322_s25 }
  0x17   : > { %337 = vmatpush3.msra.mxu0 %v148_v3  ;;  %v139_v6 = vld [vmem:[%s138_s3] sm:$0xff]  ;;  %s241_s3 = scalar_lea.sflag [#allocation4], %s132_s23  ;;  %p399_p13 = pneg %p398_p12 }
  0x18   : > { %338 = vmatprep.subr.mxu0 %v459_v2  ;;  %155 = vperm.xlu0 %395, %v139_v6   ;;  %s402_s13 = scalar_lea.vmem %s401_s6, 256 }
  0x19   : > { %339 = vmatpush3.msra.mxu0 %v147_v4  ;;  %p404_p1 = scmp.lt.s32.totalorder %s402_s13, %s396_s4 }
  0x1a   : > { %340 = vmatprep.subr.mxu0 %v459_v2 }
  0x1b   : > { %341 = vmatpush3.msra.mxu0 %v146_v5  ;;  %p405_p2 = por %p404_p1, %p403_p0 }
  0x1c   : > { %342 = vmatprep.subr.mxu0 %v459_v2  ;;  %v160_v15 = vld [vmem:[#allocation2] sm:$0xff] }
  0x1d   : > { %343 = vmatpush3.msra.mxu0 %v145_v7  ;;  %p406_p3 = pnand %p405_p2, %p399_p13 }
  0x1e   : > { %344 = vmatprep.subr.mxu0 %v459_v2 }
  0x1f   : > { %345 = vmatpush3.msra.mxu0 %v144_v8 }
  0x20   : > { %346 = vmatprep.subr.mxu0 %v459_v2 }
  0x21   : > { %347 = vmatpush3.msra.mxu0 %v143_v9 }
  0x22   : > { %348 = vmatprep.subr.mxu0 %v459_v2 }
  0x23   : > { %349 = vmatpush3.msra.mxu0 %v142_v10 }
  0x93   : > { %v156_v13 = vpop.permute.xlu0 %155 }
  0x94   : > { %vm157_vm3 = vcmp.eq.s32.totalorder %v156_v13, %v151_v12 }
  0x95   : > { %v319_v14 = vsel %vm157_vm3, 1.0, %v459_v2 }
  0x96   : > { %351 = vmatmul.mubr.msk.f32.vlgmr.msra.gmra.mxu0 %vm161_vm2, %v319_v14 }
 0x156   : > { %v231_v16 = vpop.f32.mrf.mxu0 }
 0x157   : > { %v235_v17 = vadd.f32 %v231_v16, %v160_v15 }
 0x158   : > { %v352_v18 = vpop.f32.mrf.mxu0 }
 0x159   : > { %236 = vst.msk [vmem:[#allocation2] sm:$0xff] %vm140_vm1, %v235_v17 }
 0x160   : > { %v237_v19 = vld [vmem:[#allocation2] sm:$0xff] }
 0x161   : > { %v238_v20 = vmul.f32 5.656854, %v237_v19 }
 0x163   : > { %239 = vst.msk [vmem:[%s134_s26] sm:$0xff] %vm140_vm1, %v238_v20 }
 0x164   : > { %409 = shalt.err (!%p406_p3)
}
 0x165   : > { %s410_s7 = scalar_lea.hbm %s252_s30, 128  ;;  %s414_s16 = scalar_lea.hbm %s593_s2, 256 }
 0x166   : > { %p411_p4 = scmp.ne.s32.totalorder %s252_s30, %s410_s7  ;;  %p415_p9 = scmp.lt.s32.totalorder %s252_s30, %s593_s2 }
 0x167   : > { %p416_p10 = scmp.lt.s32.totalorder %s414_s16, %s410_s7 }
 0x168   : > { %p412_p7 = pnand %p411_p4, %p515_p5 }
 0x169   : > { %p417_p11 = por %p416_p10, %p415_p9 }
 0x16a   : > { %p413_p8 = pneg %p412_p7 }
 0x16c   : > { %p418_p12 = pnand %p417_p11, %p413_p8 }
 0x16e   : > { %421 = shalt.err (!%p418_p12)
}
 0x16f   : > { %353 = dma.vmem_to_hbm [thread:$0]  (%p515_p5), %s255_s27, 128, %s252_s30, %s241_s3  }
 0x170 PF: > { %p359_p13 = scmp.ge.s32.totalorder %s456_s12, 2  ;;  %s266_s22 = sand.u32 1, %s444_s9  }
 0x171   : > { %s267_s23 = scalar_lea.sflag [#allocation4], %s266_s22 }
 0x172   : > { %p356_p0 = pnand %p359_p13, %p519_p6 }
 0x174   : > { %p357_p1 = pneg %p356_p0 }
 0x176   : > { %439 = dma.done.wait (%p357_p1), %s267_s23, 128  }
 0x177   : > { %441 = vsyncadd (%p357_p1), %s267_s23, 4294967168  ;;  %p12_p2 = scmp.ge.s32.totalorder %s502_s15, 4   ;;  %s596_s9 = smov %s448_s10 }
 0x178   : > { %s597_s10 = smov %s452_s11  ;;  %s598_s11 = smov %s513_s18 }
 0x179   : > { %s599_s12 = smov %s502_s15  ;;  %14 = sbr.rel (!%p12_p2) target bundleno = 3 (0x3), region = 63 }
 0x17e   :  { %272 = vsyncpa [#allocation4], 1 }
 0x17f   :  { %274 = vsyncpa [#allocation4 + $0x1], 1 }

</bundles_post_ra>
